<compile_context>
chip_gen: v7x
topology: tpu7x:2x2x1
jax: 0.10.0
libtpu: 0.0.40
codegen_flags: <defaults>
</compile_context>

<pallas_src>
import functools
import math

import numpy as np
import jax
import jax.numpy as jnp
from jax.experimental import pallas as pl
from jax.experimental.pallas import tpu as pltpu


def _round_up(x, mult):
    return ((x + mult - 1) // mult) * mult


# ----------------------------------------------------------------------------
# Kernels (channel-major, flat spatial lanes).
# ----------------------------------------------------------------------------
def _down_block_kernel(patches_ref, w0_ref, w1_ref, o_ref, a_ref,
                       *, oh, ow, negval, base):
    """Fused: stride-2 conv (one K=9*cin dot) + LeakyReLU + stride-1 conv."""
    m = oh * ow
    c0 = a_ref.shape[0]
    lpad = a_ref.shape[1]

    # ---- stage 1: stride-2 3x3 conv as ONE MXU matmul + LeakyReLU ---------
    acc0 = jnp.dot(w0_ref[...], patches_ref[...],
                   preferred_element_type=jnp.float32)          # (c0, m) f32
    y0 = jnp.where(acc0 >= 0, acc0, acc0 * negval)

    # ---- park intermediate in the zero-bordered flat VMEM scratch ---------
    # Only the (small) borders are zeroed; the interior is rewritten every
    # step.  Zeroing every step (not @pl.when(pid==0)) keeps this correct
    # when the "parallel" batch axis is sharded across TensorCores.
    a_ref[:, pl.ds(0, base)] = jnp.zeros((c0, base), a_ref.dtype)
    trail = lpad - base - m
    a_ref[:, pl.ds(base + m, trail)] = jnp.zeros((c0, trail), a_ref.dtype)
    # 128-aligned, lane-dense interior store (base is a multiple of 128).
    a_ref[:, pl.ds(base, m)] = y0.astype(a_ref.dtype)

    # ---- stage 2: final stride-1 3x3 conv from the flat scratch -----------
    # Vertical padding = real zero lanes in the borders; horizontal padding
    # emulated by post-matmul edge masks (wrapped reads are finite bf16
    # activations, so masking after the matmul is exact).
    col = jax.lax.broadcasted_iota(jnp.int32, (1, m), 1) % ow
    mask_l = (col != 0).astype(jnp.float32)        # kw==0 taps wrap at c==0
    mask_r = (col != ow - 1).astype(jnp.float32)   # kw==2 taps wrap at c==ow-1

    cf = w1_ref.shape[1]
    acc = jnp.zeros((cf, m), jnp.float32)          # single live accumulator
    for kh in range(3):                            # static unroll, 9 taps
        for kw in range(3):
            off = base - ow - 1 + kh * ow + kw     # static lane offset
            patch = a_ref[:, pl.ds(off, m)]                     # (c0, m) bf16
            contrib = jnp.dot(w1_ref[kh * 3 + kw], patch,
                              preferred_element_type=jnp.float32)
            if kw == 0:
                contrib = contrib * mask_l
            elif kw == 2:
                contrib = contrib * mask_r
            acc = acc + contrib
    o_ref[...] = acc.astype(o_ref.dtype)


def _s2_only_kernel(patches_ref, w0_ref, o_ref, *, negval):
    """Stand-alone stride-2 conv + LeakyReLU (only used when scale > 2)."""
    acc = jnp.dot(w0_ref[...], patches_ref[...],
                  preferred_element_type=jnp.float32)
    o_ref[...] = jnp.where(acc >= 0, acc, acc * negval).astype(o_ref.dtype)


# ----------------------------------------------------------------------------
# Wrapper-side layout plumbing (pure XLA, done once per stage).
# ----------------------------------------------------------------------------
def _make_patches(x_nchw, oh, ow):
    """im2col for a stride-2 3x3 conv, padding=1 -> (N, 9*cin, oh*ow) bf16.

    Row t*cin+ci (t = kh*3+kw) at lane r*ow+c holds x_pad[ci, 2r+kh, 2c+kw].
    """
    n, cin, _, _ = x_nchw.shape
    x_pad = jnp.pad(x_nchw, ((0, 0), (0, 0), (1, 1), (1, 1)))
    taps = []
    for kh in range(3):
        for kw in range(3):
            t = x_pad[:, :, kh:kh + 2 * oh:2, kw:kw + 2 * ow:2]  # (n,cin,oh,ow)
            taps.append(t.reshape(n, cin, oh * ow))
    return jnp.concatenate(taps, axis=1).astype(jnp.bfloat16)   # (n, 9*cin, m)


def _prep_w_s2(w_hwio):
    """HWIO (3,3,cin,cout) -> (cout, 9*cin) bf16 (tap-major contraction)."""
    cin, cout = w_hwio.shape[2], w_hwio.shape[3]
    return (jnp.transpose(w_hwio, (3, 0, 1, 2))
            .reshape(cout, 9 * cin).astype(jnp.bfloat16))


def _prep_w_s1(w_hwio):
    """HWIO (3,3,cin,cout) -> (9, cout, cin) bf16 per-tap matmul weights."""
    cin, cout = w_hwio.shape[2], w_hwio.shape[3]
    return (jnp.transpose(w_hwio, (0, 1, 3, 2))
            .reshape(9, cout, cin).astype(jnp.bfloat16))


# ----------------------------------------------------------------------------
# pallas_call builders.
# ----------------------------------------------------------------------------
_VMEM_LIMIT = 48 * 1024 * 1024   # safe on v5e/v6e (128 MiB) and v7x (64 MiB/TC)


def _fused_call(patches, w0r, w1r, *, oh, ow, negval):
    n, k0, m = patches.shape
    c0 = w0r.shape[0]
    cf = w1r.shape[1]
    cin = k0 // 9
    base = _round_up(ow + 1, 128)                 # 128-aligned interior start
    lpad = base + m + _round_up(ow + 1, 128)      # zero borders on both sides
    kern = functools.partial(_down_block_kernel, oh=oh, ow=ow,
                             negval=negval, base=base)
    flops = 2 * 9 * m * (cin * c0 + c0 * cf) * n
    bytes_acc = 2 * (patches.size + w0r.size + w1r.size) + 4 * n * cf * m
    return pl.pallas_call(
        kern,
        out_shape=jax.ShapeDtypeStruct((n, cf, m), jnp.float32),
        grid=(n,),
        in_specs=[
            pl.BlockSpec((None, k0, m), lambda b: (b, 0, 0)),
            pl.BlockSpec((c0, k0), lambda b: (0, 0)),
            pl.BlockSpec((9, cf, c0), lambda b: (0, 0, 0)),
        ],
        out_specs=pl.BlockSpec((None, cf, m), lambda b: (b, 0, 0)),
        scratch_shapes=[pltpu.VMEM((c0, lpad), jnp.bfloat16)],
        compiler_params=pltpu.CompilerParams(
            dimension_semantics=("parallel",),
            vmem_limit_bytes=_VMEM_LIMIT),
        cost_estimate=pl.CostEstimate(
            flops=flops, transcendentals=0, bytes_accessed=bytes_acc),
    )(patches, w0r, w1r)


def _s2_call(patches, w0r, *, negval):
    n, k0, m = patches.shape
    c0 = w0r.shape[0]
    cin = k0 // 9
    kern = functools.partial(_s2_only_kernel, negval=negval)
    return pl.pallas_call(
        kern,
        out_shape=jax.ShapeDtypeStruct((n, c0, m), jnp.bfloat16),
        grid=(n,),
        in_specs=[
            pl.BlockSpec((None, k0, m), lambda b: (b, 0, 0)),
            pl.BlockSpec((c0, k0), lambda b: (0, 0)),
        ],
        out_specs=pl.BlockSpec((None, c0, m), lambda b: (b, 0, 0)),
        compiler_params=pltpu.CompilerParams(
            dimension_semantics=("parallel",),
            vmem_limit_bytes=_VMEM_LIMIT),
        cost_estimate=pl.CostEstimate(
            flops=2 * 9 * m * cin * c0 * n, transcendentals=0,
            bytes_accessed=2 * (patches.size + w0r.size + n * c0 * m)),
    )(patches, w0r)


# ----------------------------------------------------------------------------
# DownBlock forward (NCHW f32 in / NCHW f32 out, like PyTorch).
# ----------------------------------------------------------------------------
def down_block_forward(x_nchw, weights, *, strides, negval):
    n_s2 = len(weights) - 1                 # number of stride-2 stages
    assert n_s2 >= 1, "DownBlock needs scale >= 2"
    assert list(strides) == [2] * n_s2 + [1]

    n = x_nchw.shape[0]
    x = x_nchw
    for li in range(n_s2):
        h, wd = x.shape[2], x.shape[3]
        oh, ow = (h - 1) // 2 + 1, (wd - 1) // 2 + 1
        patches = _make_patches(x, oh, ow)
        w0r = _prep_w_s2(weights[li])
        if li == n_s2 - 1:
            # Last stride-2 stage: fuse the final stride-1 conv into the call.
            w1r = _prep_w_s1(weights[-1])
            cf = weights[-1].shape[3]
            out_flat = _fused_call(patches, w0r, w1r,
                                   oh=oh, ow=ow, negval=negval)
            return out_flat.reshape(n, cf, oh, ow)       # already NCHW
        # Extra stride-2 stages (scale > 2): one lean call each.
        c0 = weights[li].shape[3]
        y_flat = _s2_call(patches, w0r, negval=negval)
        x = y_flat.reshape(n, c0, oh, ow)


# ----------------------------------------------------------------------------
# Weight init + plain-JAX reference (correctness check only).
# ----------------------------------------------------------------------------
def init_down_block_weights(key, scale, n_feats, in_channels, out_channels):
    """Deterministic synthetic weights matching DownBlock.__init__ shapes."""
    layers = []
    cin = in_channels
    for _ in range(int(np.log2(scale))):      # all stride-2 conv layers
        layers.append((cin, n_feats, 2))
        cin = n_feats
    layers.append((cin, out_channels, 1))     # final stride-1 conv

    weights = []
    keys = jax.random.split(key, len(layers))
    for k, (ci, co, _) in zip(keys, layers):
        std = math.sqrt(2.0 / (9 * ci))       # kaiming-like scale
        weights.append(jax.random.normal(k, (3, 3, ci, co), jnp.float32) * std)
    strides = [s for (_, _, s) in layers]
    return weights, strides


def down_block_reference(x_nchw, weights, strides, negval):
    """Same math, same bf16-operand / f32-accumulation contract as the kernel."""
    a = x_nchw
    n_layers = len(weights)
    for i, (w, s) in enumerate(zip(weights, strides)):
        y = jax.lax.conv_general_dilated(
            a.astype(jnp.bfloat16), w.astype(jnp.bfloat16),
            window_strides=(s, s), padding=((1, 1), (1, 1)),
            dimension_numbers=('NCHW', 'HWIO', 'NCHW'),
            preferred_element_type=jnp.float32)
        if i != n_layers - 1:
            y = jnp.where(y >= 0, y, y * negval)
        a = y
    return a


if __name__ == "__main__":
    # Small deterministic config (opt.negval, opt.n_feats, opt.n_colors, scale)
    n_feats = 8
    in_channels = 4
    out_channels = 4
    negval = 0.2
    N, H, W = 2, 16, 16

    key = jax.random.PRNGKey(0)
    k_x, k_w = jax.random.split(key)
    x = jax.random.normal(k_x, (N, in_channels, H, W), jnp.float32)

    # scale=2 exercises the fused kernel; scale=4 also exercises the
    # stand-alone stride-2 kernel (multi-stage path).
    for scale in (2, 4):
        weights, strides = init_down_block_weights(
            jax.random.fold_in(k_w, scale), scale,
            n_feats, in_channels, out_channels)
        fwd = jax.jit(functools.partial(down_block_forward,
                                        strides=strides, negval=negval))
        out = jax.block_until_ready(fwd(x, weights))
        ref = jax.block_until_ready(
            down_block_reference(x, weights, strides, negval))
        assert out.shape == (N, out_channels, H // scale, W // scale), out.shape
        np.testing.assert_allclose(np.asarray(out), np.asarray(ref),
                                   rtol=2e-2, atol=2e-2)
    print("KERNEL_OK")
</pallas_src>

<mosaic_0001>
module attributes {stable_mosaic.version = 11 : i64} {
  func.func @_down_block_kernel(%arg0: i32, %arg1: memref<1x36x64xbf16, #tpu.memory_space<vmem>>, %arg2: memref<8x36xbf16, #tpu.memory_space<vmem>>, %arg3: memref<9x4x8xbf16, #tpu.memory_space<vmem>>, %arg4: memref<1x4x64xf32, #tpu.memory_space<vmem>>, %arg5: memref<8x320xbf16, #tpu.memory_space<vmem>>) attributes {dimension_semantics = [#tpu.dimension_semantics<parallel>], iteration_bounds = array<i64: 2>, scalar_prefetch = 0 : i64, scratch_operands = 1 : i64, tpu.core_type = #tpu.core_type<tc>, window_params = [{transform_indices = @transform_0, window_bounds = array<i64: 1, 36, 64>}, {pipeline_mode = #tpu.pipeline_mode<synchronous>, transform_indices = @transform_1, window_bounds = array<i64: 8, 36>}, {pipeline_mode = #tpu.pipeline_mode<synchronous>, transform_indices = @transform_2, window_bounds = array<i64: 9, 4, 8>}, {transform_indices = @transform_3, window_bounds = array<i64: 1, 4, 64>}]} {
    %c0 = arith.constant 0 : index
    %c0_0 = arith.constant 0 : index
    %0 = vector.load %arg2[%c0, %c0_0] : memref<8x36xbf16, #tpu.memory_space<vmem>>, vector<8x36xbf16>
    %c0_1 = arith.constant 0 : index
    %c0_2 = arith.constant 0 : index
    %c0_3 = arith.constant 0 : index
    %1 = vector.load %arg1[%c0_1, %c0_2, %c0_3] : memref<1x36x64xbf16, #tpu.memory_space<vmem>>, vector<1x36x64xbf16>
    %2 = vector.shape_cast %1 : vector<1x36x64xbf16> to vector<36x64xbf16>
    %cst = arith.constant dense<0.000000e+00> : vector<8x64xf32>
    %3 = tpu.matmul %0, %2, %cst {dimension_numbers = #tpu.dot_dimension_numbers<[1], [0], [0], [1], [0, 0, 1, 1], [], []>} : vector<8x36xbf16>, vector<36x64xbf16>, vector<8x64xf32> -> vector<8x64xf32>
    %cst_4 = arith.constant 0.000000e+00 : f32
    %4 = vector.broadcast %cst_4 : f32 to vector<8x64xf32>
    %5 = arith.cmpf oge, %3, %4 : vector<8x64xf32>
    %cst_5 = arith.constant 2.000000e-01 : f32
    %6 = vector.broadcast %cst_5 : f32 to vector<8x64xf32>
    %7 = arith.mulf %3, %6 : vector<8x64xf32>
    %8 = arith.select %5, %3, %7 : vector<8x64xi1>, vector<8x64xf32>
    %cst_6 = arith.constant 0.000000e+00 : bf16
    %9 = vector.broadcast %cst_6 : bf16 to vector<8x128xbf16>
    %c0_7 = arith.constant 0 : index
    %c0_8 = arith.constant 0 : index
    %10 = vector.load %arg5[%c0_7, %c0_8] : memref<8x320xbf16, #tpu.memory_space<vmem>>, vector<8x128xbf16>
    tpu.vector_store %arg5[%c0_7, %c0_8], %9 {strides = array<i32>} : memref<8x320xbf16, #tpu.memory_space<vmem>>, vector<8x128xbf16>,
    %cst_9 = arith.constant 0.000000e+00 : bf16
    %11 = vector.broadcast %cst_9 : bf16 to vector<8x128xbf16>
    %c0_10 = arith.constant 0 : index
    %c192 = arith.constant 192 : index
    %12 = vector.load %arg5[%c0_10, %c192] : memref<8x320xbf16, #tpu.memory_space<vmem>>, vector<8x128xbf16>
    tpu.vector_store %arg5[%c0_10, %c192], %11 {strides = array<i32>} : memref<8x320xbf16, #tpu.memory_space<vmem>>, vector<8x128xbf16>,
    %13 = arith.truncf %8 : vector<8x64xf32> to vector<8x64xbf16>
    %c0_11 = arith.constant 0 : index
    %c128 = arith.constant 128 : index
    %14 = vector.load %arg5[%c0_11, %c128] : memref<8x320xbf16, #tpu.memory_space<vmem>>, vector<8x64xbf16>
    tpu.vector_store %arg5[%c0_11, %c128], %13 {strides = array<i32>} : memref<8x320xbf16, #tpu.memory_space<vmem>>, vector<8x64xbf16>,
    %15 = tpu.iota {dimensions = array<i32: 1>} : vector<1x64xi32>
    %c8_i32 = arith.constant 8 : i32
    %c0_i32 = arith.constant 0 : i32
    %16 = arith.cmpi eq, %c8_i32, %c0_i32 : i32
    %c1_i32 = arith.constant 1 : i32
    %17 = arith.select %16, %c1_i32, %c8_i32 : i32
    %18 = vector.broadcast %17 : i32 to vector<1x64xi32>
    %19 = arith.remsi %15, %18 : vector<1x64xi32>
    %c0_i32_12 = arith.constant 0 : i32
    %20 = vector.broadcast %c0_i32_12 : i32 to vector<1x64xi32>
    %21 = arith.cmpi ne, %19, %20 : vector<1x64xi32>
    %c0_i32_13 = arith.constant 0 : i32
    %22 = vector.broadcast %c0_i32_13 : i32 to vector<1x64xi32>
    %23 = arith.cmpi slt, %19, %22 : vector<1x64xi32>
    %c0_i32_14 = arith.constant 0 : i32
    %24 = arith.cmpi slt, %17, %c0_i32_14 : i32
    %25 = vector.broadcast %24 : i1 to vector<1x64xi1>
    %26 = vector.broadcast %25 : vector<1x64xi1> to vector<1x64xi1>
    %27 = arith.xori %23, %26 : vector<1x64xi1>
    %28 = arith.andi %27, %21 : vector<1x64xi1>
    %29 = vector.broadcast %17 : i32 to vector<1x64xi32>
    %30 = arith.addi %19, %29 : vector<1x64xi32>
    %31 = arith.select %28, %30, %19 : vector<1x64xi1>, vector<1x64xi32>
    %c0_i32_15 = arith.constant 0 : i32
    %32 = vector.broadcast %c0_i32_15 : i32 to vector<1x64xi32>
    %33 = arith.cmpi ne, %31, %32 : vector<1x64xi32>
    %34 = arith.extui %33 : vector<1x64xi1> to vector<1x64xi32>
    %35 = arith.sitofp %34 : vector<1x64xi32> to vector<1x64xf32>
    %c7_i32 = arith.constant 7 : i32
    %36 = vector.broadcast %c7_i32 : i32 to vector<1x64xi32>
    %37 = arith.cmpi ne, %31, %36 : vector<1x64xi32>
    %38 = arith.extui %37 : vector<1x64xi1> to vector<1x64xi32>
    %39 = arith.sitofp %38 : vector<1x64xi32> to vector<1x64xf32>
    %cst_16 = arith.constant 0.000000e+00 : f32
    %40 = vector.broadcast %cst_16 : f32 to vector<4x64xf32>
    %c0_17 = arith.constant 0 : index
    %c119 = arith.constant 119 : index
    %41 = vector.load %arg5[%c0_17, %c119] : memref<8x320xbf16, #tpu.memory_space<vmem>>, vector<8x64xbf16>
    %c0_18 = arith.constant 0 : index
    %c0_19 = arith.constant 0 : index
    %c0_20 = arith.constant 0 : index
    %42 = vector.load %arg3[%c0_18, %c0_19, %c0_20] : memref<9x4x8xbf16, #tpu.memory_space<vmem>>, vector<1x4x8xbf16>
    %43 = vector.shape_cast %42 : vector<1x4x8xbf16> to vector<4x8xbf16>
    %cst_21 = arith.constant dense<0.000000e+00> : vector<4x64xf32>
    %44 = tpu.matmul %43, %41, %cst_21 {dimension_numbers = #tpu.dot_dimension_numbers<[1], [0], [0], [1], [0, 0, 1, 1], [], []>} : vector<4x8xbf16>, vector<8x64xbf16>, vector<4x64xf32> -> vector<4x64xf32>
    %45 = vector.broadcast %35 : vector<1x64xf32> to vector<4x64xf32>
    %46 = arith.mulf %44, %45 : vector<4x64xf32>
    %47 = arith.addf %40, %46 : vector<4x64xf32>
    %c0_22 = arith.constant 0 : index
    %c120 = arith.constant 120 : index
    %48 = vector.load %arg5[%c0_22, %c120] : memref<8x320xbf16, #tpu.memory_space<vmem>>, vector<8x64xbf16>
    %c1 = arith.constant 1 : index
    %c0_23 = arith.constant 0 : index
    %c0_24 = arith.constant 0 : index
    %49 = vector.load %arg3[%c1, %c0_23, %c0_24] : memref<9x4x8xbf16, #tpu.memory_space<vmem>>, vector<1x4x8xbf16>
    %50 = vector.shape_cast %49 : vector<1x4x8xbf16> to vector<4x8xbf16>
    %cst_25 = arith.constant dense<0.000000e+00> : vector<4x64xf32>
    %51 = tpu.matmul %50, %48, %cst_25 {dimension_numbers = #tpu.dot_dimension_numbers<[1], [0], [0], [1], [0, 0, 1, 1], [], []>} : vector<4x8xbf16>, vector<8x64xbf16>, vector<4x64xf32> -> vector<4x64xf32>
    %52 = arith.addf %47, %51 : vector<4x64xf32>
    %c0_26 = arith.constant 0 : index
    %c121 = arith.constant 121 : index
    %53 = vector.load %arg5[%c0_26, %c121] : memref<8x320xbf16, #tpu.memory_space<vmem>>, vector<8x64xbf16>
    %c2 = arith.constant 2 : index
    %c0_27 = arith.constant 0 : index
    %c0_28 = arith.constant 0 : index
    %54 = vector.load %arg3[%c2, %c0_27, %c0_28] : memref<9x4x8xbf16, #tpu.memory_space<vmem>>, vector<1x4x8xbf16>
    %55 = vector.shape_cast %54 : vector<1x4x8xbf16> to vector<4x8xbf16>
    %cst_29 = arith.constant dense<0.000000e+00> : vector<4x64xf32>
    %56 = tpu.matmul %55, %53, %cst_29 {dimension_numbers = #tpu.dot_dimension_numbers<[1], [0], [0], [1], [0, 0, 1, 1], [], []>} : vector<4x8xbf16>, vector<8x64xbf16>, vector<4x64xf32> -> vector<4x64xf32>
    %57 = vector.broadcast %39 : vector<1x64xf32> to vector<4x64xf32>
    %58 = arith.mulf %56, %57 : vector<4x64xf32>
    %59 = arith.addf %52, %58 : vector<4x64xf32>
    %c0_30 = arith.constant 0 : index
    %c127 = arith.constant 127 : index
    %60 = vector.load %arg5[%c0_30, %c127] : memref<8x320xbf16, #tpu.memory_space<vmem>>, vector<8x64xbf16>
    %c3 = arith.constant 3 : index
    %c0_31 = arith.constant 0 : index
    %c0_32 = arith.constant 0 : index
    %61 = vector.load %arg3[%c3, %c0_31, %c0_32] : memref<9x4x8xbf16, #tpu.memory_space<vmem>>, vector<1x4x8xbf16>
    %62 = vector.shape_cast %61 : vector<1x4x8xbf16> to vector<4x8xbf16>
    %cst_33 = arith.constant dense<0.000000e+00> : vector<4x64xf32>
    %63 = tpu.matmul %62, %60, %cst_33 {dimension_numbers = #tpu.dot_dimension_numbers<[1], [0], [0], [1], [0, 0, 1, 1], [], []>} : vector<4x8xbf16>, vector<8x64xbf16>, vector<4x64xf32> -> vector<4x64xf32>
    %64 = vector.broadcast %35 : vector<1x64xf32> to vector<4x64xf32>
    %65 = arith.mulf %63, %64 : vector<4x64xf32>
    %66 = arith.addf %59, %65 : vector<4x64xf32>
    %c0_34 = arith.constant 0 : index
    %c128_35 = arith.constant 128 : index
    %67 = vector.load %arg5[%c0_34, %c128_35] : memref<8x320xbf16, #tpu.memory_space<vmem>>, vector<8x64xbf16>
    %c4 = arith.constant 4 : index
    %c0_36 = arith.constant 0 : index
    %c0_37 = arith.constant 0 : index
    %68 = vector.load %arg3[%c4, %c0_36, %c0_37] : memref<9x4x8xbf16, #tpu.memory_space<vmem>>, vector<1x4x8xbf16>
    %69 = vector.shape_cast %68 : vector<1x4x8xbf16> to vector<4x8xbf16>
    %cst_38 = arith.constant dense<0.000000e+00> : vector<4x64xf32>
    %70 = tpu.matmul %69, %67, %cst_38 {dimension_numbers = #tpu.dot_dimension_numbers<[1], [0], [0], [1], [0, 0, 1, 1], [], []>} : vector<4x8xbf16>, vector<8x64xbf16>, vector<4x64xf32> -> vector<4x64xf32>
    %71 = arith.addf %66, %70 : vector<4x64xf32>
    %c0_39 = arith.constant 0 : index
    %c129 = arith.constant 129 : index
    %72 = vector.load %arg5[%c0_39, %c129] : memref<8x320xbf16, #tpu.memory_space<vmem>>, vector<8x64xbf16>
    %c5 = arith.constant 5 : index
    %c0_40 = arith.constant 0 : index
    %c0_41 = arith.constant 0 : index
    %73 = vector.load %arg3[%c5, %c0_40, %c0_41] : memref<9x4x8xbf16, #tpu.memory_space<vmem>>, vector<1x4x8xbf16>
    %74 = vector.shape_cast %73 : vector<1x4x8xbf16> to vector<4x8xbf16>
    %cst_42 = arith.constant dense<0.000000e+00> : vector<4x64xf32>
    %75 = tpu.matmul %74, %72, %cst_42 {dimension_numbers = #tpu.dot_dimension_numbers<[1], [0], [0], [1], [0, 0, 1, 1], [], []>} : vector<4x8xbf16>, vector<8x64xbf16>, vector<4x64xf32> -> vector<4x64xf32>
    %76 = vector.broadcast %39 : vector<1x64xf32> to vector<4x64xf32>
    %77 = arith.mulf %75, %76 : vector<4x64xf32>
    %78 = arith.addf %71, %77 : vector<4x64xf32>
    %c0_43 = arith.constant 0 : index
    %c135 = arith.constant 135 : index
    %79 = vector.load %arg5[%c0_43, %c135] : memref<8x320xbf16, #tpu.memory_space<vmem>>, vector<8x64xbf16>
    %c6 = arith.constant 6 : index
    %c0_44 = arith.constant 0 : index
    %c0_45 = arith.constant 0 : index
    %80 = vector.load %arg3[%c6, %c0_44, %c0_45] : memref<9x4x8xbf16, #tpu.memory_space<vmem>>, vector<1x4x8xbf16>
    %81 = vector.shape_cast %80 : vector<1x4x8xbf16> to vector<4x8xbf16>
    %cst_46 = arith.constant dense<0.000000e+00> : vector<4x64xf32>
    %82 = tpu.matmul %81, %79, %cst_46 {dimension_numbers = #tpu.dot_dimension_numbers<[1], [0], [0], [1], [0, 0, 1, 1], [], []>} : vector<4x8xbf16>, vector<8x64xbf16>, vector<4x64xf32> -> vector<4x64xf32>
    %83 = vector.broadcast %35 : vector<1x64xf32> to vector<4x64xf32>
    %84 = arith.mulf %82, %83 : vector<4x64xf32>
    %85 = arith.addf %78, %84 : vector<4x64xf32>
    %c0_47 = arith.constant 0 : index
    %c136 = arith.constant 136 : index
    %86 = vector.load %arg5[%c0_47, %c136] : memref<8x320xbf16, #tpu.memory_space<vmem>>, vector<8x64xbf16>
    %c7 = arith.constant 7 : index
    %c0_48 = arith.constant 0 : index
    %c0_49 = arith.constant 0 : index
    %87 = vector.load %arg3[%c7, %c0_48, %c0_49] : memref<9x4x8xbf16, #tpu.memory_space<vmem>>, vector<1x4x8xbf16>
    %88 = vector.shape_cast %87 : vector<1x4x8xbf16> to vector<4x8xbf16>
    %cst_50 = arith.constant dense<0.000000e+00> : vector<4x64xf32>
    %89 = tpu.matmul %88, %86, %cst_50 {dimension_numbers = #tpu.dot_dimension_numbers<[1], [0], [0], [1], [0, 0, 1, 1], [], []>} : vector<4x8xbf16>, vector<8x64xbf16>, vector<4x64xf32> -> vector<4x64xf32>
    %90 = arith.addf %85, %89 : vector<4x64xf32>
    %c0_51 = arith.constant 0 : index
    %c137 = arith.constant 137 : index
    %91 = vector.load %arg5[%c0_51, %c137] : memref<8x320xbf16, #tpu.memory_space<vmem>>, vector<8x64xbf16>
    %c8 = arith.constant 8 : index
    %c0_52 = arith.constant 0 : index
    %c0_53 = arith.constant 0 : index
    %92 = vector.load %arg3[%c8, %c0_52, %c0_53] : memref<9x4x8xbf16, #tpu.memory_space<vmem>>, vector<1x4x8xbf16>
    %93 = vector.shape_cast %92 : vector<1x4x8xbf16> to vector<4x8xbf16>
    %cst_54 = arith.constant dense<0.000000e+00> : vector<4x64xf32>
    %94 = tpu.matmul %93, %91, %cst_54 {dimension_numbers = #tpu.dot_dimension_numbers<[1], [0], [0], [1], [0, 0, 1, 1], [], []>} : vector<4x8xbf16>, vector<8x64xbf16>, vector<4x64xf32> -> vector<4x64xf32>
    %95 = vector.broadcast %39 : vector<1x64xf32> to vector<4x64xf32>
    %96 = arith.mulf %94, %95 : vector<4x64xf32>
    %97 = arith.addf %90, %96 : vector<4x64xf32>
    %c0_55 = arith.constant 0 : index
    %c0_56 = arith.constant 0 : index
    %c0_57 = arith.constant 0 : index
    %98 = vector.load %arg4[%c0_55, %c0_56, %c0_57] : memref<1x4x64xf32, #tpu.memory_space<vmem>>, vector<1x4x64xf32>
    %99 = vector.shape_cast %98 : vector<1x4x64xf32> to vector<4x64xf32>
    %100 = vector.shape_cast %97 : vector<4x64xf32> to vector<1x4x64xf32>
    tpu.vector_store %arg4[%c0_55, %c0_56, %c0_57], %100 {strides = array<i32>} : memref<1x4x64xf32, #tpu.memory_space<vmem>>, vector<1x4x64xf32>,
    return
  }
  func.func @transform_0(%arg0: i32) -> (i32, i32, i32) {
    %c0_i32 = arith.constant 0 : i32
    %c0_i32_0 = arith.constant 0 : i32
    %c0_i32_1 = arith.constant 0 : i32
    return %arg0, %c0_i32, %c0_i32_0 : i32, i32, i32
  }
  func.func @transform_1(%arg0: i32) -> (i32, i32) {
    %c0_i32 = arith.constant 0 : i32
    %c0_i32_0 = arith.constant 0 : i32
    %c0_i32_1 = arith.constant 0 : i32
    return %c0_i32, %c0_i32_0 : i32, i32
  }
  func.func @transform_2(%arg0: i32) -> (i32, i32, i32) {
    %c0_i32 = arith.constant 0 : i32
    %c0_i32_0 = arith.constant 0 : i32
    %c0_i32_1 = arith.constant 0 : i32
    %c0_i32_2 = arith.constant 0 : i32
    return %c0_i32, %c0_i32_0, %c0_i32_1 : i32, i32, i32
  }
  func.func @transform_3(%arg0: i32) -> (i32, i32, i32) {
    %c0_i32 = arith.constant 0 : i32
    %c0_i32_0 = arith.constant 0 : i32
    %c0_i32_1 = arith.constant 0 : i32
    return %arg0, %c0_i32, %c0_i32_0 : i32, i32, i32
  }
}

</mosaic_0001>

<bundles_post_ra>
// kernel: down_block_forward.1
= control target key start
LH: loop header
LB: loop body
LE: loop exit
PB: predicated region body
PF: predicated region fallthrough
CT: control target
= control target key end

     0   :  { %s1000_s12 = smov 0   ;;  %s1106_s0 = inlined_call_operand.vmem [shape: bf16[2,36,64], index: 0, kind: input, shape index: {}]   ;;  %s1107_s1 = inlined_call_operand.vmem [shape: bf16[8,36], index: 1, kind: input, shape index: {}]   ;;  %s1108_s2 = inlined_call_operand.vmem [shape: bf16[9,4,8], index: 2, kind: input, shape index: {}]   ;;  %s1109_s3 = inlined_call_operand.vmem [shape: f32[2,4,64], index: 3, kind: output, shape index: {}]  }
   0x1 LB: > { %s814_s13 = sadd.s32 4294967295, %s967_s12   ;;  %p818_p0 = scmp.ge.s32.totalorder %s967_s12, 1  ;;  %s967_s12 = sphi %s1000_s12, %s13_s12  }
   0x2   : > { %p137_p1 = scmp.lt.s32.totalorder %s967_s12, 3 }
   0x4   : > { %p138_p2 = pnand %p818_p0, %p137_p1 }
   0x5   : > { %p160_p3 = scmp.lt.s32.totalorder (!%p138_p2), %s814_s13, 1  ;;  %v969_v0 = vmov (!%p138_p2), 0.0   ;;  %vm970_vm0 = vmmov (!%p138_p2), 0   ;;  %vm195_vm1 = vcmask (!%p138_p2), 1041408   ;;  %v170_v5 = vld [vmem:[%s1107_s1] sm:$0xf] (!%p138_p2)  ;;  %v250_v53 = vlaneseq (!%p138_p2) }
   0x6   : > { %141 = sbr.rel (%p138_p2) target bundleno = 629 (0x275), region = 32  ;;  %871 = vmatprep.subr.bf16.mxu0 (!%p138_p2), %v969_v0  ;;  %877 = vmatprep.mubr.msk.bf16.mxu0 (!%p138_p2), %vm970_vm0, %v969_v0  ;;  %vm191_vm2 = vcmask (!%p138_p2), 293888   ;;  %vm243_vm3 = vcmask (!%p138_p2), 1043968   ;;  %vm244_vm4 = vcmask (!%p138_p2), 523268   ;;  %v971_v6 = vmov (!%p138_p2), 0   ;;  %s972_s20 = smov (!%p138_p2), 8  }
   0x7   : > { %881 = vmatprep.subr.bf16.mxu1 (!%p138_p2), %v969_v0  ;;  %883 = vmatprep.mubr.msk.bf16.mxu1 (!%p138_p2), %vm970_vm0, %v969_v0  ;;  %242 = vst [vmem:[#allocation2] sm:$0xf] (!%p138_p2), %v971_v6  ;;  %vm245_vm5 = vmor (!%p138_p2), %vm244_vm4, %vm243_vm3  ;;  %vm248_vm7 = vcmask (!%p138_p2), 519168   ;;  %s973_s21 = smov (!%p138_p2), 9   ;;  %s974_s22 = smov (!%p138_p2), 7   ;;  %vm281_vm8 = vcmask (!%p138_p2), 72704  }
   0x8   : > { %246 = vst.msk [vmem:[#allocation2 + $0x4] sm:$0xff] (!%p138_p2), %vm245_vm5, %v971_v6  ;;  %s975_s23 = smov (!%p138_p2), 1   ;;  %s976_s24 = smov (!%p138_p2), 121   ;;  %vm283_vm9 = vcmask (!%p138_p2), 64512   ;;  %vm287_vm10 = vcmask (!%p138_p2), 1043456   ;;  %vm394_vm11 = vcmask (!%p138_p2), 56320  }
   0x9   : > { %s977_s25 = smov (!%p138_p2), 127   ;;  %s978_s26 = smov (!%p138_p2), 119   ;;  %v271_v26 = vld [vmem:[%s1108_s2] sm:$0x3] (!%p138_p2)  ;;  %v832_v32 = vld [vmem:[%s1108_s2 + $0x4] sm:$0x3] (!%p138_p2) }
   0xa   : > { %s979_s27 = smov (!%p138_p2), 120   ;;  %vm450_vm12 = vcmask (!%p138_p2), 7168   ;;  %v830_v37 = vld [vmem:[%s1108_s2 + $0x2] sm:$0x3] (!%p138_p2)  ;;  %v836_v40 = vld [vmem:[%s1108_s2 + $0x8] sm:$0x3] (!%p138_p2) }
   0xb   : > { %v834_v43 = vld [vmem:[%s1108_s2 + $0x6] sm:$0x3] (!%p138_p2)  ;;  %v841_v46 = vld [vmem:[%s1108_s2 + $0xc] sm:$0x3] (!%p138_p2)  ;;  %v838_v49 = vld [vmem:[%s1108_s2 + $0xa] sm:$0x3] (!%p138_p2) }
   0xc   : > { %v845_v51 = vld [vmem:[%s1108_s2 + $0x10] sm:$0x3] (!%p138_p2)  ;;  %v843_v52 = vld [vmem:[%s1108_s2 + $0xe] sm:$0x3] (!%p138_p2)  ;;  %v251_v54 = vand.u32 (!%p138_p2), 127, %v250_v53 }
   0xd   : > { %s1111_s13 = smov (!%p160_p3, %s814_s13), 1 }
   0xe   : > { %s935_s14 = smul.u32 20, %s1111_s13  ;;  %v256_v55 = vand.u32 7, %v251_v54 }
  0x10   : > { %s164_s17 = scalar_lea.vmem %s1106_s0, %s935_s14  ;;  %vm264_vm13 = vcmp.ne.s32.totalorder %v256_v55, 0  ;;  %vm267_vm14 = vcmp.ne.s32.totalorder %v256_v55, 7 }
  0x11   : > { %v955_v1 = vld [vmem:[%s164_s17] sm:$0xff]   ;;  %v956_v2 = vld [vmem:[%s164_s17 + $0x8] sm:$0xff]   ;;  %v957_v3 = vld [vmem:[%s164_s17 + $0x10] ss:$0 sps:$4 sm:$0x33]   ;;  %v825_v60 = vsel %vm264_vm13, 1.0, %v969_v0 }
  0x12   : > { %872 = vmatpush3.bf16.msra.mxu0 %v955_v1  ;;  %v197_v4 = vsel %vm195_vm1, %v957_v3, 0  ;;  %v826_v61 = vsel %vm267_vm14, 1.0, %v969_v0 }
  0x13   : > { %873 = vmatprep.subr.bf16.mxu0 %v969_v0 }
  0x16   : > { %874 = vmatpush3.bf16.msra.mxu0 %v956_v2 }
  0x17   : > { %875 = vmatprep.subr.bf16.mxu0 %v969_v0 }
  0x1a   : > { %876 = vmatpush3.bf16.msra.mxu0 %v197_v4 }
  0x1b   : > { %893 = vmatprep.subr.bf16.mxu0 %v969_v0 }
  0x1d   : > { %878 = vmatmul.mubr.msk.bf16.vlgmr.msra.gmra.mrb[0].mxu0 %vm191_vm2, %v170_v5 }
  0x1e   : > { %895 = vmatprep.mubr.msk.bf16.mxu0 %vm970_vm0, %v969_v0 }
  0xf0   : > { %v233_v7 = vpop.f32.mrb[0].mxu0 }
  0xf1   : > { %vm239_vm6 = vcmp.ge.f32.partialorder %v233_v7, 0.0  ;;  %v240_v8 = vmul.f32 0.2, %v233_v7  ;;  %v879_v9 = vpop.f32.mrb[1].mxu0 }
  0xf2   : > { %v236_v10 = vpop.f32.mrb[2].mxu0 }
  0xf3   : > { %v241_v11 = vsel %vm239_vm6, %v233_v7, %v240_v8  ;;  %v880_v12 = vpop.f32.mrb[3].mxu0 }
  0xf4   : > { %v247_v13 = vpack.c.bf16 %v241_v11, %v241_v11 }
  0xf6   : > { %249 = vst.msk [vmem:[#allocation2 + $0x4] sm:$0xf] %vm248_vm7, %v247_v13 }
  0xfd   : > { %v270_v14 = vld [vmem:[#allocation2] sm:$0xff] }
  0xfe   : > { %v827_v15 = vcombine.low %v270_v14, %v270_v14  ;;  %v828_v16 = vcombine.high %v270_v14, %v270_v14  ;;  %v500_v17 = vld [vmem:[#allocation2 + $0x4] sm:$0xf] }
  0xff   : > { %v839_v18 = vcombine.low %v500_v17, %v500_v17  ;;  %v507_v35 = vsel %vm287_vm10, %v500_v17, 0 }
 0x100   : > { %335 = vrot.lane.b32.xlu1 %v827_v15, %s972_s20  ;;  %277 = vrot.lane.b32.xlu0 %v827_v15, %s973_s21 }
 0x104   : > { %337 = vrot.lane.b32.xlu1 %v828_v16, %s972_s20  ;;  %279 = vrot.lane.b32.xlu0 %v828_v16, %s973_s21  ;;  %s820_s21 = sshll.u32 %s1111_s13, 2 }
 0x108   : > { %392 = vrot.lane.b32.xlu1 %v828_v16, %s974_s22  ;;  %390 = vrot.lane.b32.xlu0 %v827_v15, %s974_s22 }
 0x10c   : > { %448 = vrot.lane.b32.xlu1 %v828_v16, %s975_s23  ;;  %446 = vrot.lane.b32.xlu0 %v827_v15, %s975_s23 }
 0x110   : > { %607 = vrot.lane.b32.xlu1 %v839_v18, %s976_s24  ;;  %555 = vrot.lane.b32.xlu0 %v839_v18, %s977_s25  ;;  %s168_s24 = scalar_lea.vmem %s1109_s3, %s820_s21 }
 0x114   : > { %710 = vrot.lane.b32.xlu1 %v839_v18, %s978_s26  ;;  %659 = vrot.lane.b32.xlu0 %v839_v18, %s979_s27 }
 0x172   : > { %v336_v19 = vpop.permute.xlu1 %335  ;;  %v278_v20 = vpop.permute.xlu0 %277 }
 0x176   : > { %v338_v21 = vpop.permute.xlu1 %337  ;;  %v280_v22 = vpop.permute.xlu0 %279 }
 0x177   : > { %v282_v23 = vsel %vm281_vm8, %v278_v20, %v280_v22  ;;  %v340_v25 = vsel %vm283_vm9, %v336_v19, %v338_v21 }
 0x178   : > { %v289_v24 = vsel %vm287_vm10, %v282_v23, 0  ;;  %v345_v30 = vsel %vm287_vm10, %v340_v25, 0 }
 0x179   : > { %882 = vmatpush3.bf16.msra.mxu1 %v289_v24 }
 0x17a   : > { %v393_v27 = vpop.permute.xlu1 %392  ;;  %v391_v28 = vpop.permute.xlu0 %390  ;;  %887 = vmatprep.subr.bf16.mxu1 %v969_v0 }
 0x17b   : > { %v395_v29 = vsel %vm394_vm11, %v391_v28, %v393_v27 }
 0x17c   : > { %v400_v31 = vsel %vm287_vm10, %v395_v29, 0  ;;  %884 = vmatmul.mubr.msk.bf16.vlgmr.msra.gmra.mrb[0].mxu1 %vm283_vm9, %v271_v26 }
 0x17d   : > { %888 = vmatpush3.bf16.msra.mxu1 %v345_v30  ;;  %894 = vmatpush3.bf16.msra.mxu0 %v400_v31 }
 0x17e   : > { %v449_v33 = vpop.permute.xlu1 %448  ;;  %v447_v34 = vpop.permute.xlu0 %446  ;;  %905 = vmatprep.subr.bf16.mxu0 %v969_v0  ;;  %889 = vmatprep.mubr.msk.bf16.mxu1 %vm970_vm0, %v969_v0 }
 0x17f   : > { %899 = vmatprep.subr.bf16.mxu1 %v969_v0  ;;  %v451_v36 = vsel %vm450_vm12, %v447_v34, %v449_v33 }
 0x180   : > { %896 = vmatmul.mubr.msk.bf16.vlgmr.msra.gmra.mrb[4].mxu0 %vm283_vm9, %v832_v32  ;;  %v456_v38 = vsel %vm287_vm10, %v451_v36, 0 }
 0x181   : > { %906 = vmatpush3.bf16.msra.mxu0 %v507_v35  ;;  %907 = vmatprep.mubr.msk.bf16.mxu0 %vm970_vm0, %v969_v0 }
 0x182   : > { %917 = vmatprep.subr.bf16.mxu0 %v969_v0  ;;  %v608_v39 = vpop.permute.xlu1 %607  ;;  %v556_v42 = vpop.permute.xlu0 %555 }
 0x183   : > { %v613_v41 = vsel %vm287_vm10, %v608_v39, 0  ;;  %v561_v44 = vsel %vm287_vm10, %v556_v42, 0 }
 0x184   : > { %890 = vmatmul.mubr.msk.bf16.vlgmr.msra.gmra.mrb[4].mxu1 %vm283_vm9, %v830_v37 }
 0x185   : > { %900 = vmatpush3.bf16.msra.mxu1 %v456_v38  ;;  %901 = vmatprep.mubr.msk.bf16.mxu1 %vm970_vm0, %v969_v0 }
 0x186   : > { %911 = vmatprep.subr.bf16.mxu1 %v969_v0  ;;  %v711_v45 = vpop.permute.xlu1 %710  ;;  %v660_v48 = vpop.permute.xlu0 %659 }
 0x187   : > { %v716_v47 = vsel %vm287_vm10, %v711_v45, 0  ;;  %v665_v50 = vsel %vm287_vm10, %v660_v48, 0 }
 0x188   : > { %908 = vmatmul.mubr.msk.bf16.vlgmr.msra.gmra.mrb[8].mxu0 %vm283_vm9, %v836_v40 }
 0x189   : > { %918 = vmatpush3.bf16.msra.mxu0 %v613_v41  ;;  %919 = vmatprep.mubr.msk.bf16.mxu0 %vm970_vm0, %v969_v0 }
 0x18a   : > { %929 = vmatprep.subr.bf16.mxu0 %v969_v0 }
 0x18c   : > { %902 = vmatmul.mubr.msk.bf16.vlgmr.msra.gmra.mrb[8].mxu1 %vm283_vm9, %v834_v43 }
 0x18d   : > { %912 = vmatpush3.bf16.msra.mxu1 %v561_v44  ;;  %913 = vmatprep.mubr.msk.bf16.mxu1 %vm970_vm0, %v969_v0 }
 0x18e   : > { %923 = vmatprep.subr.bf16.mxu1 %v969_v0 }
 0x190   : > { %920 = vmatmul.mubr.msk.bf16.vlgmr.msra.gmra.mrb[12].mxu0 %vm283_vm9, %v841_v46 }
 0x191   : > { %930 = vmatpush3.bf16.msra.mxu0 %v716_v47  ;;  %931 = vmatprep.mubr.msk.bf16.mxu0 %vm970_vm0, %v969_v0 }
 0x194   : > { %914 = vmatmul.mubr.msk.bf16.vlgmr.msra.gmra.mrb[12].mxu1 %vm283_vm9, %v838_v49 }
 0x195   : > { %924 = vmatpush3.bf16.msra.mxu1 %v665_v50  ;;  %925 = vmatprep.mubr.msk.bf16.mxu1 %vm970_vm0, %v969_v0 }
 0x198   : > { %932 = vmatmul.mubr.msk.bf16.vlgmr.msra.gmra.mrb[16].mxu0 %vm283_vm9, %v845_v51 }
 0x19c   : > { %926 = vmatmul.mubr.msk.bf16.vlgmr.msra.gmra.mrb[16].mxu1 %vm283_vm9, %v843_v52 }
 0x24f   : > { %v325_v56 = vpop.f32.mrb[0].mxu1 }
 0x250   : > { %v885_v57 = vpop.f32.mrb[1].mxu1  ;;  %v331_v2 = vmul.f32 %v825_v60, %v325_v56 }
 0x251   : > { %v328_v58 = vpop.f32.mrb[2].mxu1 }
 0x252   : > { %v886_v59 = vpop.f32.mrb[3].mxu1 }
 0x253   : > { %v436_v62 = vpop.f32.mrb[4].mxu0 }
 0x254   : > { %v897_v63 = vpop.f32.mrb[5].mxu0  ;;  %v442_v3 = vmul.f32 %v826_v61, %v436_v62 }
 0x255   : > { %v439_v1 = vpop.f32.mrb[6].mxu0 }
 0x256   : > { %v898_v4 = vpop.f32.mrb[7].mxu0 }
 0x257   : > { %v381_v5 = vpop.f32.mrb[4].mxu1 }
 0x258   : > { %v387_v6 = vadd.f32 %v381_v5, %v331_v2  ;;  %v891_v7 = vpop.f32.mrb[5].mxu1 }
 0x259   : > { %v384_v8 = vpop.f32.mrb[6].mxu1 }
 0x25a   : > { %v443_v9 = vadd.f32 %v442_v3, %v387_v6  ;;  %v892_v10 = vpop.f32.mrb[7].mxu1 }
 0x25b   : > { %v543_v11 = vpop.f32.mrb[8].mxu0 }
 0x25c   : > { %v909_v12 = vpop.f32.mrb[9].mxu0 }
 0x25d   : > { %v546_v13 = vpop.f32.mrb[10].mxu0 }
 0x25e   : > { %v910_v14 = vpop.f32.mrb[11].mxu0 }
 0x25f   : > { %v492_v15 = vpop.f32.mrb[8].mxu1 }
 0x260   : > { %v498_v16 = vmul.f32 %v825_v60, %v492_v15  ;;  %v903_v17 = vpop.f32.mrb[9].mxu1 }
 0x261   : > { %v495_v0 = vpop.f32.mrb[10].mxu1 }
 0x262   : > { %v499_v18 = vadd.f32 %v498_v16, %v443_v9  ;;  %v904_v19 = vpop.f32.mrb[11].mxu1 }
 0x263   : > { %v649_v20 = vpop.f32.mrb[12].mxu0 }
 0x264   : > { %v921_v21 = vpop.f32.mrb[13].mxu0  ;;  %v549_v22 = vadd.f32 %v543_v11, %v499_v18  ;;  %v655_v29 = vmul.f32 %v825_v60, %v649_v20 }
 0x265   : > { %v652_v23 = vpop.f32.mrb[14].mxu0 }
 0x266   : > { %v922_v24 = vpop.f32.mrb[15].mxu0 }
 0x267   : > { %v597_v25 = vpop.f32.mrb[12].mxu1 }
 0x268   : > { %v603_v26 = vmul.f32 %v826_v61, %v597_v25  ;;  %v915_v27 = vpop.f32.mrb[13].mxu1 }
 0x269   : > { %v600_v28 = vpop.f32.mrb[14].mxu1 }
 0x26a   : > { %v604_v30 = vadd.f32 %v603_v26, %v549_v22  ;;  %v916_v31 = vpop.f32.mrb[15].mxu1 }
 0x26b   : > { %v752_v32 = vpop.f32.mrb[16].mxu0 }
 0x26c   : > { %v933_v33 = vpop.f32.mrb[17].mxu0  ;;  %v656_v34 = vadd.f32 %v655_v29, %v604_v30  ;;  %v758_v36 = vmul.f32 %v826_v61, %v752_v32 }
 0x26d   : > { %v755_v35 = vpop.f32.mrb[18].mxu0 }
 0x26e   : > { %v934_v37 = vpop.f32.mrb[19].mxu0 }
 0x26f   : > { %v701_v38 = vpop.f32.mrb[16].mxu1 }
 0x270   : > { %v707_v39 = vadd.f32 %v701_v38, %v656_v34  ;;  %v927_v40 = vpop.f32.mrb[17].mxu1 }
 0x271   : > { %v704_v41 = vpop.f32.mrb[18].mxu1 }
 0x272   : > { %v759_v42 = vadd.f32 %v758_v36, %v707_v39  ;;  %v928_v43 = vpop.f32.mrb[19].mxu1 }
 0x274   : > { %760 = vst.msk [vmem:[%s168_s24] sm:$0xf] %vm248_vm7, %v759_v42 }
 0x275 PF: > { %s13_s12 = sadd.s32 1, %s967_s12  }
 0x276   : > { %p10_p4 = scmp.ge.s32.totalorder %s13_s12, 4  }
 0x278   :  { %12 = sbr.rel (!%p10_p4) target bundleno = 1 (0x1), region = 70 }

</bundles_post_ra>
